<compile_context>
chip_gen: v7x
topology: tpu7x:2x2x1
jax: 0.10.0
libtpu: 0.0.40
codegen_flags: <defaults>
</compile_context>

<pallas_src>
import functools

import jax
import jax.numpy as jnp
from jax.experimental import pallas as pl
from jax.experimental.pallas import tpu as pltpu


def _round_up(v, m):
    return ((v + m - 1) // m) * m


def _vmem_budget_bytes():
    """~85% of per-core physical VMEM (generation-aware), conservative fallback."""
    cap = None
    try:
        cap = getattr(pltpu.get_tpu_info(), "vmem_capacity_bytes", None)
    except Exception:
        cap = None
    if not cap:
        cap = 64 << 20  # v7x has the smallest physical VMEM (64 MiB)
    return int(0.85 * cap)


# --------------------------- single-pass kernel ----------------------------


def _gate_onepass_kernel(x_ref, w_ref, b_ref, o_ref, *, inv_hw):
    # x_ref: (1, c, hw) native dtype; w_ref: (c, c) native dtype; b_ref: (c, 1) f32
    x = x_ref[0]                                                    # (c, hw)

    # Spatial mean: exact lane reduction for f32; MXU dot-with-ones (f32
    # accumulation, no full-block cast/temp) for sub-f32 inputs.
    if x.dtype == jnp.float32:
        ssum = jnp.sum(x, axis=1, keepdims=True)                    # (c, 1) f32
    else:
        ones = jnp.ones((x.shape[1], 1), dtype=x.dtype)
        ssum = jnp.dot(x, ones, preferred_element_type=jnp.float32)
    avg = ssum * inv_hw

    # Block extent == array extent, so no masking is needed for the max.
    mx = jnp.max(x, axis=1, keepdims=True).astype(jnp.float32)      # (c, 1)

    pooled = jnp.concatenate([avg, mx], axis=1)                     # (c, 2)

    # Shared Linear applied to both pooled vectors in one fused MXU matmul,
    # weight in its natural (out_features, in_features) orientation.
    z = jnp.dot(w_ref[...], pooled.astype(w_ref.dtype),
                preferred_element_type=jnp.float32) + b_ref[...]    # (c, 2)
    s = jax.nn.sigmoid(z)                                           # EUP
    scale = 0.5 * (s[:, 0:1] + s[:, 1:2])                           # (c, 1) f32

    # Memory-bound broadcast multiply in the input's native dtype.
    o_ref[0] = x * scale.astype(x.dtype)


# ----------------------- two-pass (hw-tiled) fallback -----------------------


def _pool_mlp_kernel(x_ref, w_ref, b_ref, scale_ref, sum_sc, max_sc, *,
                     real_hw, hw_tile):
    t = pl.program_id(1)
    nt = pl.num_programs(1)

    @pl.when(t == 0)
    def _init():
        sum_sc[...] = jnp.zeros_like(sum_sc)
        max_sc[...] = jnp.full_like(max_sc, -jnp.inf)

    x = x_ref[0]                                                    # (c, hw_tile)
    if real_hw % hw_tile != 0:
        # Ragged last tile: mask out-of-range lanes (fallback path only).
        lane = jax.lax.broadcasted_iota(jnp.int32, x.shape, 1) + t * hw_tile
        valid = lane < real_hw
        x_sum = jnp.where(valid, x, jnp.zeros((), x.dtype))
        x_max = jnp.where(valid, x, jnp.finfo(x.dtype).min)
    else:
        x_sum = x
        x_max = x

    if x_sum.dtype == jnp.float32:
        part = jnp.sum(x_sum, axis=1, keepdims=True)                # (c, 1) f32
    else:
        ones = jnp.ones((x_sum.shape[1], 1), dtype=x_sum.dtype)
        part = jnp.dot(x_sum, ones, preferred_element_type=jnp.float32)
    sum_sc[...] += part
    max_sc[...] = jnp.maximum(
        max_sc[...], jnp.max(x_max, axis=1, keepdims=True).astype(jnp.float32))

    @pl.when(t == nt - 1)
    def _finish():
        avg = sum_sc[...] * (1.0 / real_hw)
        pooled = jnp.concatenate([avg, max_sc[...]], axis=1)        # (c, 2)
        z = jnp.dot(w_ref[...], pooled.astype(w_ref.dtype),
                    preferred_element_type=jnp.float32) + b_ref[...]
        s = jax.nn.sigmoid(z)
        scale_ref[0] = 0.5 * (s[:, 0:1] + s[:, 1:2])                # (c, 1) f32


def _scale_mul_kernel(x_ref, scale_ref, o_ref):
    x = x_ref[0]                                                    # (c, hw_tile)
    o_ref[0] = x * scale_ref[0].astype(x.dtype)                     # lane broadcast


def _pick_hw_tile(c_sub, hw, itemsize, budget):
    # Pass 2 keeps in + out blocks double-buffered: ~5 blocks of (c_sub, tile).
    denom = 5 * c_sub * itemsize
    tile = (max(budget, 0) // denom) // 128 * 128
    tile = max(128, min(tile, _round_up(hw, 128)))
    return int(tile)


def _gate_two_pass(x3, weight, bias2d, hw, hw_tile, vmem_limit):
    b, c, _ = x3.shape
    nt = pl.cdiv(hw, hw_tile)

    scale = pl.pallas_call(
        functools.partial(_pool_mlp_kernel, real_hw=hw, hw_tile=hw_tile),
        out_shape=jax.ShapeDtypeStruct((b, c, 1), jnp.float32),
        grid=(b, nt),
        in_specs=[
            pl.BlockSpec((1, c, hw_tile), lambda i, t: (i, 0, t)),
            pl.BlockSpec(weight.shape, lambda i, t: (0, 0)),
            pl.BlockSpec(bias2d.shape, lambda i, t: (0, 0)),
        ],
        out_specs=pl.BlockSpec((1, c, 1), lambda i, t: (i, 0, 0)),
        scratch_shapes=[pltpu.VMEM((c, 1), jnp.float32),
                        pltpu.VMEM((c, 1), jnp.float32)],
        compiler_params=pltpu.CompilerParams(
            dimension_semantics=("parallel", "arbitrary"),
            vmem_limit_bytes=vmem_limit),
    )(x3, weight, bias2d)

    out3 = pl.pallas_call(
        _scale_mul_kernel,
        out_shape=jax.ShapeDtypeStruct(x3.shape, x3.dtype),
        grid=(b, nt),  # both axes parallel -> keeps both v7x TCs busy at small b
        in_specs=[
            pl.BlockSpec((1, c, hw_tile), lambda i, t: (i, 0, t)),
            pl.BlockSpec((1, c, 1), lambda i, t: (i, 0, 0)),
        ],
        out_specs=pl.BlockSpec((1, c, hw_tile), lambda i, t: (i, 0, t)),
        compiler_params=pltpu.CompilerParams(
            dimension_semantics=("parallel", "parallel"),
            vmem_limit_bytes=vmem_limit),
    )(x3, scale)
    return out3


# -------------------------------- wrapper -----------------------------------


def gate_forward(x_nchw, weight, bias, *, max_vmem_bytes=None):
    """x_nchw: (b, c, h, w); weight: (c, c) = (out_features, in_features); bias: (c,)."""
    b, c, h, w = x_nchw.shape
    hw = h * w
    x3 = x_nchw.reshape(b, c, hw)                 # pure bitcast, no HBM copy
    weight = jnp.asarray(weight)
    bias2d = jnp.asarray(bias, dtype=jnp.float32).reshape(c, 1)

    itemsize = jnp.dtype(x_nchw.dtype).itemsize
    w_itemsize = jnp.dtype(weight.dtype).itemsize
    c_sub = _round_up(c, max(8, 32 // itemsize))      # internal sublane padding
    hw_lane = _round_up(hw, 128)                      # internal lane padding
    w_bytes = _round_up(c, max(8, 32 // w_itemsize)) * _round_up(c, 128) * w_itemsize
    b_bytes = _round_up(c, 8) * 128 * 4
    param_bytes = 2 * (w_bytes + b_bytes)             # (double-buffered, DMA'd once)

    hw_cap = _vmem_budget_bytes()
    budget = hw_cap if max_vmem_bytes is None else int(max_vmem_bytes)

    block_bytes = c_sub * hw_lane * itemsize
    # in + out blocks double-buffered (+1 block of temp headroom) + params.
    est_single = 5 * block_bytes + param_bytes + (1 << 20)

    if est_single <= budget:
        vmem_limit = None
        if est_single > (16 << 20):                   # v5e default scoped limit
            vmem_limit = int(min(2 * est_single, hw_cap))
        cost = pl.CostEstimate(
            flops=int(b * (3 * c * hw + 4 * c * c)),
            transcendentals=int(2 * b * c),
            bytes_accessed=int(2 * b * c * hw * itemsize + c * c * w_itemsize + c * 4),
        )
        out3 = pl.pallas_call(
            functools.partial(_gate_onepass_kernel, inv_hw=1.0 / hw),
            out_shape=jax.ShapeDtypeStruct(x3.shape, x3.dtype),
            grid=(b,),
            in_specs=[
                pl.BlockSpec((1, c, hw), lambda i: (i, 0, 0)),
                pl.BlockSpec(weight.shape, lambda i: (0, 0)),
                pl.BlockSpec(bias2d.shape, lambda i: (0, 0)),
            ],
            out_specs=pl.BlockSpec((1, c, hw), lambda i: (i, 0, 0)),
            compiler_params=pltpu.CompilerParams(
                dimension_semantics=("parallel",),
                vmem_limit_bytes=vmem_limit),
            cost_estimate=cost,
        )(x3, weight, bias2d)
    else:
        hw_tile = _pick_hw_tile(c_sub, hw, itemsize, budget - param_bytes)
        est_two = 5 * c_sub * hw_tile * itemsize + param_bytes + (1 << 20)
        vmem_limit = None
        if est_two > (16 << 20):
            vmem_limit = int(min(2 * est_two, hw_cap))
        out3 = _gate_two_pass(x3, weight, bias2d, hw, hw_tile, vmem_limit)

    return out3.reshape(b, c, h, w)


def gate_reference(x_nchw, weight, bias):
    """Pure-JAX reference of the PyTorch Gate.forward."""
    xf = x_nchw.astype(jnp.float32)
    avg = jnp.mean(xf, axis=(2, 3))                   # (b, c)
    mx = jnp.max(xf, axis=(2, 3))                     # (b, c)
    s_avg = jax.nn.sigmoid(avg @ weight.T + bias)
    s_max = jax.nn.sigmoid(mx @ weight.T + bias)
    scale = 0.5 * (s_avg + s_max)
    return (xf * scale[:, :, None, None]).astype(x_nchw.dtype)


if __name__ == "__main__":
    # Small shapes consistent with Gate(gate_channels=c) applied to NCHW input.
    b, c, h, w = 2, 4, 16, 16

    key = jax.random.PRNGKey(0)
    kx, kw, kb, kx2 = jax.random.split(key, 4)

    x = jax.random.normal(kx, (b, c, h, w), dtype=jnp.float32)

    # Deterministic parameter init (nn.Linear(c, c) default-ish: uniform).
    bound = 1.0 / (c ** 0.5)
    weight = jax.random.uniform(kw, (c, c), jnp.float32, -bound, bound)
    bias = jax.random.uniform(kb, (c,), jnp.float32, -bound, bound)

    out = jax.block_until_ready(gate_forward(x, weight, bias))
    ref = gate_reference(x, weight, bias)
    assert out.shape == (b, c, h, w)
    assert jnp.allclose(out, ref, atol=1e-5, rtol=1e-5), "single-pass mismatch"

    # Also exercise the hw-tiled two-pass fallback (forced via a tiny VMEM
    # budget) on a shape whose h*w is NOT a multiple of the 128-lane tile.
    x2 = jax.random.normal(kx2, (2, 4, 10, 13), dtype=jnp.float32)
    out2 = jax.block_until_ready(
        gate_forward(x2, weight, bias, max_vmem_bytes=40 << 10))
    ref2 = gate_reference(x2, weight, bias)
    assert jnp.allclose(out2, ref2, atol=1e-5, rtol=1e-5), "two-pass mismatch"

    print("KERNEL_OK")
</pallas_src>

<mosaic_0001>
module attributes {stable_mosaic.version = 11 : i64} {
  func.func @_gate_onepass_kernel(%arg0: i32, %arg1: memref<1x4x256xf32, #tpu.memory_space<vmem>>, %arg2: memref<4x4xf32, #tpu.memory_space<vmem>>, %arg3: memref<4x1xf32, #tpu.memory_space<vmem>>, %arg4: memref<1x4x256xf32, #tpu.memory_space<vmem>>) attributes {dimension_semantics = [#tpu.dimension_semantics<parallel>], iteration_bounds = array<i64: 2>, scalar_prefetch = 0 : i64, scratch_operands = 0 : i64, tpu.core_type = #tpu.core_type<tc>, window_params = [{transform_indices = @transform_0, window_bounds = array<i64: 1, 4, 256>}, {pipeline_mode = #tpu.pipeline_mode<synchronous>, transform_indices = @transform_1, window_bounds = array<i64: 4, 4>}, {pipeline_mode = #tpu.pipeline_mode<synchronous>, transform_indices = @transform_2, window_bounds = array<i64: 4, 1>}, {transform_indices = @transform_3, window_bounds = array<i64: 1, 4, 256>}]} {
    %c0 = arith.constant 0 : index
    %c0_0 = arith.constant 0 : index
    %c0_1 = arith.constant 0 : index
    %0 = vector.load %arg1[%c0, %c0_0, %c0_1] : memref<1x4x256xf32, #tpu.memory_space<vmem>>, vector<1x4x256xf32>
    %1 = vector.shape_cast %0 : vector<1x4x256xf32> to vector<4x256xf32>
    %cst = arith.constant dense<0.000000e+00> : vector<4xf32>
    %2 = vector.multi_reduction <add>, %1, %cst [1] : vector<4x256xf32> to vector<4xf32>
    %3 = vector.shape_cast %2 : vector<4xf32> to vector<4x1xf32>
    %cst_2 = arith.constant 3.906250e-03 : f32
    %4 = vector.broadcast %cst_2 : f32 to vector<4x1xf32>
    %5 = arith.mulf %3, %4 : vector<4x1xf32>
    %cst_3 = arith.constant dense<0xFF800000> : vector<4xf32>
    %6 = vector.multi_reduction <maximumf>, %1, %cst_3 [1] : vector<4x256xf32> to vector<4xf32>
    %7 = vector.shape_cast %6 : vector<4xf32> to vector<4x1xf32>
    %8 = tpu.concatenate %5, %7 in 1 : vector<4x1xf32>, vector<4x1xf32> -> vector<4x2xf32>
    %c0_4 = arith.constant 0 : index
    %c0_5 = arith.constant 0 : index
    %9 = vector.load %arg2[%c0_4, %c0_5] : memref<4x4xf32, #tpu.memory_space<vmem>>, vector<4x4xf32>
    %cst_6 = arith.constant dense<0.000000e+00> : vector<4x2xf32>
    %10 = tpu.matmul %9, %8, %cst_6 {dimension_numbers = #tpu.dot_dimension_numbers<[1], [0], [0], [1], [0, 0, 1, 1], [], []>} : vector<4x4xf32>, vector<4x2xf32>, vector<4x2xf32> -> vector<4x2xf32>
    %c0_7 = arith.constant 0 : index
    %c0_8 = arith.constant 0 : index
    %11 = vector.load %arg3[%c0_7, %c0_8] : memref<4x1xf32, #tpu.memory_space<vmem>>, vector<4x1xf32>
    %12 = vector.broadcast %11 : vector<4x1xf32> to vector<4x2xf32>
    %13 = arith.addf %10, %12 : vector<4x2xf32>
    %14 = arith.negf %13 : vector<4x2xf32>
    %15 = math.exp %14 : vector<4x2xf32>
    %cst_9 = arith.constant 1.000000e+00 : f32
    %16 = vector.broadcast %cst_9 : f32 to vector<4x2xf32>
    %17 = arith.addf %16, %15 : vector<4x2xf32>
    %18 = arith.divf %16, %17 : vector<4x2xf32>
    %19 = vector.extract_strided_slice %18 {offsets = [0, 0], sizes = [4, 1], strides = [1, 1]} : vector<4x2xf32> to vector<4x1xf32>
    %20 = vector.extract_strided_slice %18 {offsets = [0, 1], sizes = [4, 1], strides = [1, 1]} : vector<4x2xf32> to vector<4x1xf32>
    %21 = arith.addf %19, %20 : vector<4x1xf32>
    %cst_10 = arith.constant 5.000000e-01 : f32
    %22 = vector.broadcast %cst_10 : f32 to vector<4x1xf32>
    %23 = arith.mulf %22, %21 : vector<4x1xf32>
    %24 = vector.broadcast %23 : vector<4x1xf32> to vector<4x256xf32>
    %25 = arith.mulf %1, %24 : vector<4x256xf32>
    %c0_11 = arith.constant 0 : index
    %c0_12 = arith.constant 0 : index
    %c0_13 = arith.constant 0 : index
    %26 = vector.load %arg4[%c0_11, %c0_12, %c0_13] : memref<1x4x256xf32, #tpu.memory_space<vmem>>, vector<1x4x256xf32>
    %27 = vector.shape_cast %26 : vector<1x4x256xf32> to vector<4x256xf32>
    %28 = vector.shape_cast %25 : vector<4x256xf32> to vector<1x4x256xf32>
    tpu.vector_store %arg4[%c0_11, %c0_12, %c0_13], %28 {strides = array<i32>} : memref<1x4x256xf32, #tpu.memory_space<vmem>>, vector<1x4x256xf32>,
    return
  }
  func.func @transform_0(%arg0: i32) -> (i32, i32, i32) {
    %c0_i32 = arith.constant 0 : i32
    %c0_i32_0 = arith.constant 0 : i32
    %c0_i32_1 = arith.constant 0 : i32
    return %arg0, %c0_i32, %c0_i32_0 : i32, i32, i32
  }
  func.func @transform_1(%arg0: i32) -> (i32, i32) {
    %c0_i32 = arith.constant 0 : i32
    %c0_i32_0 = arith.constant 0 : i32
    %c0_i32_1 = arith.constant 0 : i32
    return %c0_i32, %c0_i32_0 : i32, i32
  }
  func.func @transform_2(%arg0: i32) -> (i32, i32) {
    %c0_i32 = arith.constant 0 : i32
    %c0_i32_0 = arith.constant 0 : i32
    %c0_i32_1 = arith.constant 0 : i32
    return %c0_i32, %c0_i32_0 : i32, i32
  }
  func.func @transform_3(%arg0: i32) -> (i32, i32, i32) {
    %c0_i32 = arith.constant 0 : i32
    %c0_i32_0 = arith.constant 0 : i32
    %c0_i32_1 = arith.constant 0 : i32
    return %arg0, %c0_i32, %c0_i32_0 : i32, i32, i32
  }
}

</mosaic_0001>

<bundles_post_ra>
// kernel: tpu_custom_call.1
= control target key start
LH: loop header
LB: loop body
LE: loop exit
PB: predicated region body
PF: predicated region fallthrough
CT: control target
= control target key end

     0   :  { %8 = vsyncpa [#allocation3], 0  ;;  %s785_s0 = inlined_call_operand.hbm [shape: f32[2,4,256], index: 0, kind: input, shape index: {}]   ;;  %s786_s1 = inlined_call_operand.vmem [shape: f32[4,4], index: 1, kind: input, shape index: {}]   ;;  %s787_s2 = inlined_call_operand.vmem [shape: f32[4,1], index: 2, kind: input, shape index: {}]   ;;  %s788_s3 = inlined_call_operand.hbm [shape: f32[2,4,256], index: 3, kind: output, shape index: {}]  }
   0x1   :  { %10 = vsyncpa [#allocation3 + $0x1], 0 }
   0x2   :  { %11 = vsyncpa [#allocation4], 0 }
   0x3   :  { %13 = vsyncpa [#allocation4 + $0x1], 0  ;;  %s609_s12 = smov 0   ;;  %s611_s13 = smov 0  }
   0x4   :  { %s613_s14 = smov 0   ;;  %s615_s15 = smov 0  }
   0x5 LB: > { %s630_s16 = sadd.s32 4294967295, %s580_s15   ;;  %s400_s17 = sadd.s32 4294967294, %s580_s15   ;;  %s580_s15 = sphi %s615_s15, %s803_s15   ;;  %s576_s14 = sphi %s613_s14, %s802_s14   ;;  %s572_s13 = sphi %s611_s13, %s801_s13   ;;  %s568_s12 = sphi %s609_s12, %s800_s12  }
   0x6   : > { %s634_s18 = sadd.s32 1, %s580_s15   ;;  %s26_s19 = sadd.s32 1, %s576_s14 }
   0x7   : > { %s23_s20 = ssub.s32 %s580_s15, %s634_s18  ;;  %p33_p0 = scmp.ne.s32.totalorder %s576_s14, %s572_s13 }
   0x8   : > { %p24_p1 = scmp.eq.s32.totalorder %s23_s20, 0  ;;  %p34_p2 = scmp.eq.s32.totalorder %s580_s15, 0 }
   0x9   : > { %p39_p3 = scmp.ne.s32.totalorder %s572_s13, %s568_s12  ;;  %p40_p4 = scmp.eq.s32.totalorder %s630_s16, 0 }
   0xa   : > { %s646_s21 = scalar_select %p24_p1, %s576_s14, %s26_s19  }
   0xb   : > { %p648_p5 = por %p34_p2, %p33_p0  ;;  %p652_p6 = por %p40_p4, %p39_p3 }
   0xc   : > { %p105_p7 = scmp.eq.s32.totalorder %s630_s16, 1  ;;  %p111_p8 = scmp.eq.s32.totalorder %s400_s17, 1 }
   0xd   : > { %p438_p10 = scmp.lt.s32.totalorder %s580_s15, 2  ;;  %s137_s26 = sand.u32 1, %s576_s14  }
   0xe   : > { %p659_p11 = por %p105_p7, %p33_p0  ;;  %p663_p12 = por %p111_p8, %p39_p3 }
   0xf   : > { %s417_s27 = sshll.u32 %s580_s15, 7  ;;  %s403_s28 = sshll.u32 %s137_s26, 3 }
  0x10   : > { %s792_s24 = scalar_select %p659_p11, 1, 0 }
  0x11   : > { %s793_s25 = scalar_select %p663_p12, 1, 0 }
  0x12   : > { %s672_s4 = scalar_lea.hbm %s785_s0, %s417_s27  ;;  %s141_s5 = scalar_lea.vmem [#allocation2], %s403_s28 }
  0x13   : > { %s149_s6 = sshll.u32 %s141_s5, 4  ;;  %p676_p13 = pnand %p438_p10, %p648_p5  ;;  %s680_s6 = int_to_ptr.vmem [resolvable:$true] %s149_s6 }
  0x14   : > { %s138_s8 = scalar_lea.sflag [#allocation3], %s137_s26  ;;  %s484_s9 = scalar_lea.hbm %s672_s4, 128 }
  0x15   : > { %p485_p2 = scmp.ne.s32.totalorder %s672_s4, %s484_s9  ;;  %p486_p3 = pneg %p676_p13 }
  0x16   : > { %s489_s17 = scalar_lea.hbm %s785_s0, 256  ;;  %p490_p5 = scmp.lt.u32.totalorder %s672_s4, %s785_s0 }
  0x17   : > { %p487_p4 = pnand %p486_p3, %p485_p2  ;;  %p491_p8 = scmp.lt.u32.totalorder %s489_s17, %s484_s9 }
  0x18   : > { %p493_p9 = scmp.lt.u32.totalorder %s484_s9, %s672_s4 }
  0x19   : > { %p488_p7 = pneg %p487_p4  ;;  %p492_p10 = por %p491_p8, %p490_p5 }
  0x1b   : > { %p494_p0 = por %p493_p9, %p492_p10 }
  0x1d   : > { %p495_p1 = pnand %p494_p0, %p488_p7 }
  0x1f   : > { %498 = shalt.err (!%p495_p1)
}
  0x20   : > { %s499_s22 = scalar_lea.vmem %s680_s6, 128  ;;  %s582_s26 = smov [#allocation2]  }
  0x21   : > { %p500_p2 = scmp.ne.s32.totalorder %s680_s6, %s499_s22  ;;  %s504_s27 = sshll.u32 %s582_s26, 4  ;;  %s505_s27 = int_to_ptr.vmem [resolvable:$false] %s504_s27 }
  0x22   : > { %s506_s28 = scalar_lea.vmem %s505_s27, 256  ;;  %p507_p11 = scmp.lt.s32.totalorder %s680_s6, %s505_s27 }
  0x23   : > { %p502_p4 = pnand %p500_p2, %p486_p3  ;;  %p508_p5 = scmp.lt.s32.totalorder %s506_s28, %s499_s22 }
  0x25   : > { %p503_p12 = pneg %p502_p4  ;;  %p509_p8 = por %p508_p5, %p507_p11 }
  0x27   : > { %p510_p9 = pnand %p509_p8, %p503_p12 }
  0x29   : > { %513 = shalt.err (!%p510_p9)
}
  0x2a   : > { %433 = dma.hbm_to_vmem [thread:$0]  (!%p676_p13), %s672_s4, 128, %s680_s6, %s138_s8  }
  0x2b   : > { %p795_p0 = scmp.lt.s32.totalorder %s580_s15, 3  ;;  %p796_p1 = scmp.ge.s32.totalorder %s580_s15, 1 }
  0x2d   : > { %p155_p3 = pnand %p796_p1, %p795_p0 }
  0x2e   : > { %s714_s29 = sand.u32 (!%p155_p3), 1, %s572_s13  }
  0x2f   : > { %158 = sbr.rel (%p155_p3) target bundleno = 714 (0x2ca), region = 32  ;;  %s407_s30 = sshll.u32 (!%p155_p3), %s714_s29, 3 }
  0x30   : > { %s161_s5 = scalar_lea.sflag (!%p155_p3), [#allocation3], %s714_s29  ;;  %s164_s7 = scalar_lea.vmem (!%p155_p3), [#allocation2], %s407_s30 }
  0x36   : > { %559 = dma.done.wait (%p652_p6), %s161_s5, 128  }
  0x37   : > { %561 = vsyncadd (%p652_p6), %s161_s5, 4294967168  ;;  %vm191_vm0 = vcmask 1043456   ;;  %v187_v0 = vld [vmem:[%s164_s7] sm:$0xff]  ;;  %v583_v8 = vmov 0.0   ;;  %vm584_vm1 = vmmov 0   ;;  %v585_v10 = vmov 0  }
  0x38   : > { %v189_v1 = vcombine.high %v187_v0, %v187_v0  ;;  %v192_v2 = vsel %vm191_vm0, %v187_v0, 0.0  ;;  %v198_v4 = vsel %vm191_vm0, %v187_v0, -inf  ;;  %421 = vmatprep.subr.mxu0 %v583_v8  ;;  %423 = vmatprep.mubr.msk.f32.mxu0 %vm584_vm1, %v583_v8  ;;  %v206_v9 = vld [vmem:[%s787_s2] sm:$0xf]  ;;  %vm203_vm2 = vcmask 7168   ;;  %s586_s9 = smov 127  }
  0x39   : > { %477 = vset.pattern.permute.xlu1 %v585_v10  ;;  %478 = vset.pattern.permute.xlu0 %v585_v10  ;;  %v205_v14 = vld [vmem:[%s786_s1] sm:$0xf]  ;;  %vm212_vm3 = vcmask 31744   ;;  %v587_v27 = vmov 839922192   ;;  %v308_v29 = vlaneseq  ;;  %s418_s10 = sshll.u32 %s630_s16, 7 }
  0x3a   : > { %v193_v3 = vsel %vm191_vm0, %v189_v1, 0.0  ;;  %v199_v5 = vsel %vm191_vm0, %v189_v1, -inf  ;;  %209 = vperm.xlu1 %477, %v206_v9   ;;  %v306_v28 = vunpack.c.l.s4 %v587_v27  ;;  %s186_s11 = scalar_lea.vmem [#allocation5], %s407_s30  ;;  %s741_s22 = scalar_lea.hbm %s788_s3, %s418_s10 }
  0x3b   : > { %v194_v6 = vadd.f32 %v193_v3, %v192_v2  ;;  %v200_v7 = vmax.f32 %v198_v4, %v199_v5  ;;  %v309_v31 = vshrl.u32 %v308_v29, 7  ;;  %s330_s17 = sshll.u32 %s186_s11, 4  ;;  %s316_s26 = scalar_lea.sflag [#allocation4], %s714_s29  ;;  %s743_s17 = int_to_ptr.vmem [resolvable:$true] %s330_s17 }
  0x3c   : > { %v307_v30 = vunpack.c.0.s8 %v306_v28  ;;  %s514_s27 = scalar_lea.vmem %s743_s17, 128  ;;  %p797_p11 = scmp.ne.s32.totalorder %s792_s24, 0 }
  0x3d   : > { %195 = vadd.xlane.f32.xlu0 %v194_v6  ;;  %p515_p6 = scmp.ne.s32.totalorder %s743_s17, %s514_s27  ;;  %s588_s16 = smov [#allocation5]  }
  0x3e   : > { %v310_v32 = vsub.s32 %v307_v30, %v309_v31  ;;  %s518_s28 = sshll.u32 %s588_s16, 4  ;;  %s519_s28 = int_to_ptr.vmem [resolvable:$false] %s518_s28 }
  0x3f   : > { %p516_p12 = pnand %p515_p6, %p797_p11  ;;  %s520_s30 = scalar_lea.vmem %s519_s28, 256 }
  0x40   : > { %p521_p7 = scmp.lt.s32.totalorder %s743_s17, %s519_s28  ;;  %p522_p10 = scmp.lt.s32.totalorder %s520_s30, %s514_s27 }
  0x41   : > { %201 = vmax.xlane.f32.xlu0 %v200_v7  ;;  %p517_p13 = pneg %p516_p12 }
  0x42   : > { %p523_p2 = por %p522_p10, %p521_p7 }
  0x44   : > { %p524_p4 = pnand %p523_p2, %p517_p13 }
  0xb9   : > { %v210_v16 = vpop.permute.xlu1 %209 }
  0xca   : > { %v196_v11 = vpop.xlane.xlu0 %195 }
  0xcb   : > { %v197_v12 = vmul.f32 0.00390625, %v196_v11 }
  0xce   : > { %v202_v13 = vpop.xlane.xlu0 %201 }
  0xcf   : > { %v204_v15 = vsel %vm203_vm2, %v197_v12, %v202_v13 }
  0xd0   : > { %422 = vmatpush3.msk.msra.mxu0 %vm191_vm0, %v204_v15 }
  0xd1   : > { %424 = vmatmul.mubr.msk.f32.vlgmr.msra.gmra.mrb[0].mxu0 %vm212_vm3, %v205_v14 }
 0x1a4   : > { %v285_v17 = vpop.f32.mrb[0].mxu0 }
 0x1a5   : > { %v286_v18 = vadd.f32 %v285_v17, %v210_v16  ;;  %v425_v19 = vpop.f32.mrb[1].mxu0 }
 0x1a7   : > { %v411_v20 = vmul.f32 -1.442695, %v286_v18 }
 0x1a9   : > { %480 = vpow2.f32 %v411_v20 }
 0x1b3   : > { %v481_v21 = vpop.eup %480 }
 0x1b4   : > { %v292_v22 = vadd.f32 1.0, %v481_v21 }
 0x1b6   : > { %482 = vrcp.f32 %v292_v22 }
 0x1c0   : > { %v483_v23 = vpop.eup %482 }
 0x1c1   : > { %296 = vrot.lane.b32.xlu1 %v483_v23, %s586_s9 }
 0x233   : > { %v297_v24 = vpop.permute.xlu1 %296 }
 0x234   : > { %v299_v25 = vadd.f32 %v483_v23, %v297_v24 }
 0x236   : > { %v300_v26 = vmul.f32 0.5, %v299_v25 }
 0x238   : > { %303 = vperm.xlu0 %478, %v300_v26  }
 0x2b7   : > { %v304_v33 = vpop.permute.xlu0 %303 }
 0x2b8   : > { %v311_v34 = vrot.slane %v304_v33, %v310_v32 }
 0x2ba   : > { %v313_v35 = vmul.f32 %v311_v34, %v187_v0 }
 0x2bc   : > { %314 = vst [vmem:[%s186_s11] sm:$0xff] %v313_v35 }
 0x2bd   : > { %527 = shalt.err (!%p524_p4)
}
 0x2be   : > { %s528_s29 = scalar_lea.hbm %s741_s22, 128  ;;  %s532_s23 = scalar_lea.hbm %s788_s3, 256 }
 0x2bf   : > { %p529_p5 = scmp.ne.s32.totalorder %s741_s22, %s528_s29  ;;  %p533_p0 = scmp.lt.u32.totalorder %s741_s22, %s788_s3 }
 0x2c0   : > { %p534_p1 = scmp.lt.u32.totalorder %s532_s23, %s528_s29  ;;  %p536_p6 = scmp.lt.u32.totalorder %s528_s29, %s741_s22 }
 0x2c1   : > { %p530_p8 = pnand %p529_p5, %p797_p11 }
 0x2c2   : > { %p535_p3 = por %p534_p1, %p533_p0 }
 0x2c3   : > { %p531_p9 = pneg %p530_p8 }
 0x2c4   : > { %p537_p12 = por %p536_p6, %p535_p3 }
 0x2c6   : > { %p538_p13 = pnand %p537_p12, %p531_p9 }
 0x2c8   : > { %541 = shalt.err (!%p538_p13)
}
 0x2c9   : > { %428 = dma.vmem_to_hbm [thread:$0]  (%p797_p11), %s743_s17, 128, %s741_s22, %s316_s26  }
 0x2ca PF: > { %s342_s8 = sand.u32 1, %s568_s12   ;;  %p798_p7 = scmp.ne.s32.totalorder %s793_s25, 0 }
 0x2cb   : > { %p799_p10 = scmp.ge.s32.totalorder %s580_s15, 2  ;;  %s343_s9 = scalar_lea.sflag [#allocation4], %s342_s8 }
 0x2cd   : > { %p435_p2 = pnand %p799_p10, %p798_p7 }
 0x2cf   : > { %563 = dma.done.wait (!%p435_p2), %s343_s9, 128  }
 0x2d0   : > { %565 = vsyncadd (!%p435_p2), %s343_s9, 4294967168  ;;  %p16_p4 = scmp.ge.s32.totalorder %s634_s18, 4   ;;  %s800_s12 = smov %s572_s13 }
 0x2d1   : > { %s801_s13 = smov %s576_s14  ;;  %s802_s14 = smov %s646_s21 }
 0x2d2   : > { %s803_s15 = smov %s634_s18  ;;  %18 = sbr.rel (!%p16_p4) target bundleno = 5 (0x5), region = 77 }
 0x2d9   :  { %348 = vsyncpa [#allocation3], 1 }
 0x2da   :  { %350 = vsyncpa [#allocation3 + $0x1], 1 }
 0x2db   :  { %351 = vsyncpa [#allocation4], 1 }
 0x2dc   :  { %353 = vsyncpa [#allocation4 + $0x1], 1 }

</bundles_post_ra>
